<compile_context>
chip_gen: v5e
topology: v5e:2x2
jax: 0.10.0
libtpu: 0.0.40
codegen_flags: <defaults>
</compile_context>

<pallas_src>
import functools
import math

import jax
import jax.numpy as jnp
from jax import lax
from jax.experimental import pallas as pl
from jax.experimental.pallas import tpu as pltpu


def attn_head_kernel(xa_ref, w_ref, mask_ref, o_ref, *,
                     number_ix, inv_scale, head_dim, batch, ctx_len):
    """Single (grid-less) invocation processing all `batch` elements.

    xa_ref   : (E+1, B*C)  activations, column-major over (batch, context),
                           with a trailing row of ones (bias fold).
    w_ref    : (3H, E+1)   stacked [Wk^T|bk ; Wv^T|bv ; Wq^T|bq].
    mask_ref : (B, C)      int32 keep mask (nonzero = keep).
    o_ref    : (B, H)      output rows (wrapper reshapes to (B, H, 1)).
    """
    H, B, C = head_dim, batch, ctx_len

    xa = xa_ref[...]                           # (E+1, B*C)
    w = w_ref[...]                             # (3H, E+1)
    mask = mask_ref[...]                       # (B, C)

    # One fused projection: K, V, Q for all batches, biases folded in.
    proj = jnp.dot(w, xa, preferred_element_type=jnp.float32)   # (3H, B*C)
    kT = proj[:H, :]                           # (H, B*C)
    vT = proj[H:2 * H, :]                      # (H, B*C)
    qT = proj[2 * H:, :]                       # (H, B*C)

    # scores[b] = q_b . k_b / sqrt(C)  -> (1, C) each; reduce over H on the
    # VPU/XLU (H tiny -> keep the MXU out of the M=1 path).
    score_rows = []
    for b in range(B):
        q_b = qT[:, b * C + number_ix: b * C + number_ix + 1]   # (H, 1)
        k_b = kT[:, b * C: (b + 1) * C]                         # (H, C)
        score_rows.append(jnp.sum(q_b * k_b, axis=0, keepdims=True))
    s = jnp.concatenate(score_rows, axis=0) * inv_scale         # (B, C)

    # ignore_terms_: masked-out positions -> -inf, then softmax over context.
    s = jnp.where(mask != 0, s, -jnp.inf)
    m = jnp.max(s, axis=-1, keepdims=True)
    p = jnp.exp(s - m)
    wgt = p * pl.reciprocal(jnp.sum(p, axis=-1, keepdims=True), approx=False)

    # out[b, h] = sum_c v_b[h, c] * wgt[b, c]; assemble (B, H) and store once.
    out_rows = []
    for b in range(B):
        v_b = vT[:, b * C: (b + 1) * C]                         # (H, C)
        out_rows.append(lax.dot_general(
            wgt[b:b + 1, :], v_b,
            dimension_numbers=(((1,), (1,)), ((), ())),
            preferred_element_type=jnp.float32))                # (1, H)
    o_ref[...] = jnp.concatenate(out_rows, axis=0).astype(o_ref.dtype)


def attention_head_forward(context_embeds, keep_mask, params, number_ix=2):
    """context_embeds: (B, E, C) float32; keep_mask: (B, C) bool.
    Returns (B, H, 1) float32, matching the PyTorch module."""
    wq, bq, wk, bk, wv, bv = params
    B, E, C = context_embeds.shape
    H = wq.shape[1]
    if not (0 <= int(number_ix) < C):
        raise ValueError(f"number_ix={number_ix} out of range for context_len={C}")

    # Activation as (E, B*C) + a ones row for the bias fold.  At these sizes
    # (a few KiB) the wrapper transpose/reshape is noise.
    x = context_embeds.astype(jnp.float32)
    xa = jnp.transpose(x, (1, 0, 2)).reshape(E, B * C)          # (E, B*C)
    xa = jnp.concatenate([xa, jnp.ones((1, B * C), jnp.float32)], axis=0)

    # Stacked weights with bias column: [Wk^T|bk ; Wv^T|bv ; Wq^T|bq].
    w_stacked = jnp.concatenate([
        jnp.concatenate([jnp.transpose(wk, (1, 0)), bk.reshape(H, 1)], axis=1),
        jnp.concatenate([jnp.transpose(wv, (1, 0)), bv.reshape(H, 1)], axis=1),
        jnp.concatenate([jnp.transpose(wq, (1, 0)), bq.reshape(H, 1)], axis=1),
    ], axis=0).astype(jnp.float32)                              # (3H, E+1)

    mask_i = keep_mask.astype(jnp.int32)                        # (B, C)

    kernel = functools.partial(
        attn_head_kernel,
        number_ix=int(number_ix),
        inv_scale=1.0 / math.sqrt(C),
        head_dim=H,
        batch=B,
        ctx_len=C,
    )

    out = pl.pallas_call(
        kernel,
        out_shape=jax.ShapeDtypeStruct((B, H), jnp.float32),
        # Grid-less: whole arrays resident in VMEM, no pipeline machinery.
        in_specs=[
            pl.BlockSpec(memory_space=pltpu.MemorySpace.VMEM),  # xa
            pl.BlockSpec(memory_space=pltpu.MemorySpace.VMEM),  # stacked W|b
            pl.BlockSpec(memory_space=pltpu.MemorySpace.VMEM),  # keep_mask
        ],
        out_specs=pl.BlockSpec(memory_space=pltpu.MemorySpace.VMEM),
    )(xa, w_stacked, mask_i)

    # (B, H) -> (B, H, 1) to match torch.bmm(v, weights.transpose(2, 1)).
    return out[:, :, None]


def attention_head_reference(context_embeds, keep_mask, params, number_ix=2):
    """Pure-JAX reference mirroring the PyTorch module."""
    wq, bq, wk, bk, wv, bv = params
    xt = jnp.transpose(context_embeds, (0, 2, 1))               # (B, C, E)
    q = jnp.transpose(xt @ wq + bq, (0, 2, 1))                  # (B, H, C)
    k = jnp.transpose(xt @ wk + bk, (0, 2, 1))                  # (B, H, C)
    v = jnp.transpose(xt @ wv + bv, (0, 2, 1))                  # (B, H, C)
    q = q[:, :, number_ix][:, :, None]                          # (B, H, 1)
    C = k.shape[2]
    scores = jnp.einsum('bhq,bhc->bqc', q, k) / math.sqrt(C)    # (B, 1, C)
    scores = jnp.where(keep_mask[:, None, :], scores, -jnp.inf)
    weights = jax.nn.softmax(scores, axis=-1)                   # (B, 1, C)
    return jnp.einsum('bhc,bqc->bhq', v, weights)               # (B, H, 1)


def init_params(key, embed_dim, head_dim):
    ks = jax.random.split(key, 6)
    scale = 1.0 / math.sqrt(embed_dim)
    wq = jax.random.uniform(ks[0], (embed_dim, head_dim), jnp.float32, -scale, scale)
    bq = jax.random.uniform(ks[1], (head_dim,), jnp.float32, -scale, scale)
    wk = jax.random.uniform(ks[2], (embed_dim, head_dim), jnp.float32, -scale, scale)
    bk = jax.random.uniform(ks[3], (head_dim,), jnp.float32, -scale, scale)
    wv = jax.random.uniform(ks[4], (embed_dim, head_dim), jnp.float32, -scale, scale)
    bv = jax.random.uniform(ks[5], (head_dim,), jnp.float32, -scale, scale)
    return (wq, bq, wk, bk, wv, bv)


if __name__ == "__main__":
    B, E, C, H = 2, 32, 16, 8   # batch, embed_dim, context_len, head_dim
    number_ix = 2

    key = jax.random.PRNGKey(0)
    k_x, k_p = jax.random.split(key)

    context_embeds = jax.random.normal(k_x, (B, E, C), jnp.float32)
    # keep every other context position (at least one True per row)
    keep_mask = jnp.tile((jnp.arange(C) % 2) == 0, (B, 1))      # (B, C) bool
    params = init_params(k_p, E, H)

    out = attention_head_forward(context_embeds, keep_mask, params, number_ix)
    out = jax.block_until_ready(out)

    ref = attention_head_reference(context_embeds, keep_mask, params, number_ix)
    assert out.shape == (B, H, 1), out.shape
    assert jnp.allclose(out, ref, atol=1e-5, rtol=1e-5), float(jnp.max(jnp.abs(out - ref)))

    print("KERNEL_OK")
</pallas_src>

<mosaic_0001>
module attributes {stable_mosaic.version = 11 : i64} {
  func.func @attn_head_kernel(%arg0: memref<33x32xf32, #tpu.memory_space<vmem>>, %arg1: memref<24x33xf32, #tpu.memory_space<vmem>>, %arg2: memref<2x16xi32, #tpu.memory_space<vmem>>, %arg3: memref<2x8xf32, #tpu.memory_space<vmem>>) attributes {dimension_semantics = [], scalar_prefetch = 0 : i64, scratch_operands = 0 : i64, tpu.core_type = #tpu.core_type<tc>} {
    %c0 = arith.constant 0 : index
    %c0_0 = arith.constant 0 : index
    %0 = vector.load %arg0[%c0, %c0_0] : memref<33x32xf32, #tpu.memory_space<vmem>>, vector<33x32xf32>
    %c0_1 = arith.constant 0 : index
    %c0_2 = arith.constant 0 : index
    %1 = vector.load %arg1[%c0_1, %c0_2] : memref<24x33xf32, #tpu.memory_space<vmem>>, vector<24x33xf32>
    %c0_3 = arith.constant 0 : index
    %c0_4 = arith.constant 0 : index
    %2 = vector.load %arg2[%c0_3, %c0_4] : memref<2x16xi32, #tpu.memory_space<vmem>>, vector<2x16xi32>
    %cst = arith.constant dense<0.000000e+00> : vector<24x32xf32>
    %3 = tpu.matmul %1, %0, %cst {dimension_numbers = #tpu.dot_dimension_numbers<[1], [0], [0], [1], [0, 0, 1, 1], [], []>} : vector<24x33xf32>, vector<33x32xf32>, vector<24x32xf32> -> vector<24x32xf32>
    %4 = vector.extract_strided_slice %3 {offsets = [0, 0], sizes = [8, 32], strides = [1, 1]} : vector<24x32xf32> to vector<8x32xf32>
    %5 = vector.extract_strided_slice %3 {offsets = [8, 0], sizes = [8, 32], strides = [1, 1]} : vector<24x32xf32> to vector<8x32xf32>
    %6 = vector.extract_strided_slice %3 {offsets = [16, 0], sizes = [8, 32], strides = [1, 1]} : vector<24x32xf32> to vector<8x32xf32>
    %7 = vector.extract_strided_slice %6 {offsets = [0, 2], sizes = [8, 1], strides = [1, 1]} : vector<8x32xf32> to vector<8x1xf32>
    %8 = vector.extract_strided_slice %4 {offsets = [0, 0], sizes = [8, 16], strides = [1, 1]} : vector<8x32xf32> to vector<8x16xf32>
    %9 = vector.broadcast %7 : vector<8x1xf32> to vector<8x16xf32>
    %10 = arith.mulf %9, %8 : vector<8x16xf32>
    %cst_5 = arith.constant dense<0.000000e+00> : vector<16xf32>
    %11 = vector.multi_reduction <add>, %10, %cst_5 [0] : vector<8x16xf32> to vector<16xf32>
    %12 = vector.shape_cast %11 : vector<16xf32> to vector<1x16xf32>
    %13 = vector.extract_strided_slice %6 {offsets = [0, 18], sizes = [8, 1], strides = [1, 1]} : vector<8x32xf32> to vector<8x1xf32>
    %14 = vector.extract_strided_slice %4 {offsets = [0, 16], sizes = [8, 16], strides = [1, 1]} : vector<8x32xf32> to vector<8x16xf32>
    %15 = vector.broadcast %13 : vector<8x1xf32> to vector<8x16xf32>
    %16 = arith.mulf %15, %14 : vector<8x16xf32>
    %cst_6 = arith.constant dense<0.000000e+00> : vector<16xf32>
    %17 = vector.multi_reduction <add>, %16, %cst_6 [0] : vector<8x16xf32> to vector<16xf32>
    %18 = vector.shape_cast %17 : vector<16xf32> to vector<1x16xf32>
    %19 = tpu.concatenate %12, %18 in 0 : vector<1x16xf32>, vector<1x16xf32> -> vector<2x16xf32>
    %cst_7 = arith.constant 2.500000e-01 : f32
    %20 = vector.broadcast %cst_7 : f32 to vector<2x16xf32>
    %21 = arith.mulf %19, %20 : vector<2x16xf32>
    %c0_i32 = arith.constant 0 : i32
    %22 = vector.broadcast %c0_i32 : i32 to vector<2x16xi32>
    %23 = arith.cmpi ne, %2, %22 : vector<2x16xi32>
    %cst_8 = arith.constant 0xFF800000 : f32
    %24 = vector.broadcast %cst_8 : f32 to vector<2x16xf32>
    %25 = arith.select %23, %21, %24 : vector<2x16xi1>, vector<2x16xf32>
    %cst_9 = arith.constant dense<0xFF800000> : vector<2xf32>
    %26 = vector.multi_reduction <maximumf>, %25, %cst_9 [1] : vector<2x16xf32> to vector<2xf32>
    %27 = vector.shape_cast %26 : vector<2xf32> to vector<2x1xf32>
    %28 = vector.broadcast %27 : vector<2x1xf32> to vector<2x16xf32>
    %29 = arith.subf %25, %28 : vector<2x16xf32>
    %30 = math.exp %29 : vector<2x16xf32>
    %cst_10 = arith.constant dense<0.000000e+00> : vector<2xf32>
    %31 = vector.multi_reduction <add>, %30, %cst_10 [1] : vector<2x16xf32> to vector<2xf32>
    %32 = vector.shape_cast %31 : vector<2xf32> to vector<2x1xf32>
    %33 = tpu.reciprocal %32 : vector<2x1xf32> -> vector<2x1xf32>
    %34 = vector.broadcast %33 : vector<2x1xf32> to vector<2x16xf32>
    %35 = arith.mulf %30, %34 : vector<2x16xf32>
    %36 = vector.extract_strided_slice %5 {offsets = [0, 0], sizes = [8, 16], strides = [1, 1]} : vector<8x32xf32> to vector<8x16xf32>
    %37 = vector.extract_strided_slice %35 {offsets = [0, 0], sizes = [1, 16], strides = [1, 1]} : vector<2x16xf32> to vector<1x16xf32>
    %cst_11 = arith.constant dense<0.000000e+00> : vector<1x8xf32>
    %38 = tpu.matmul %37, %36, %cst_11 {dimension_numbers = #tpu.dot_dimension_numbers<[1], [1], [0], [0], [0, 0, 1, 0], [], []>} : vector<1x16xf32>, vector<8x16xf32>, vector<1x8xf32> -> vector<1x8xf32>
    %39 = vector.extract_strided_slice %5 {offsets = [0, 16], sizes = [8, 16], strides = [1, 1]} : vector<8x32xf32> to vector<8x16xf32>
    %40 = vector.extract_strided_slice %35 {offsets = [1, 0], sizes = [1, 16], strides = [1, 1]} : vector<2x16xf32> to vector<1x16xf32>
    %cst_12 = arith.constant dense<0.000000e+00> : vector<1x8xf32>
    %41 = tpu.matmul %40, %39, %cst_12 {dimension_numbers = #tpu.dot_dimension_numbers<[1], [1], [0], [0], [0, 0, 1, 0], [], []>} : vector<1x16xf32>, vector<8x16xf32>, vector<1x8xf32> -> vector<1x8xf32>
    %42 = tpu.concatenate %38, %41 in 0 : vector<1x8xf32>, vector<1x8xf32> -> vector<2x8xf32>
    %c0_13 = arith.constant 0 : index
    %c0_14 = arith.constant 0 : index
    %43 = vector.load %arg3[%c0_13, %c0_14] : memref<2x8xf32, #tpu.memory_space<vmem>>, vector<2x8xf32>
    tpu.vector_store %arg3[%c0_13, %c0_14], %42 {strides = array<i32>} : memref<2x8xf32, #tpu.memory_space<vmem>>, vector<2x8xf32>,
    return
  }
}

</mosaic_0001>

<bundles_post_ra>
// kernel: tpu_custom_call.1
= control target key start
LH: loop header
LB: loop body
LE: loop exit
PB: predicated region body
PF: predicated region fallthrough
CT: control target
= control target key end

     0   :  { %vm34_vm0 = vcmask 1040384   ;;  %s312_s0 = inlined_call_operand.vmem [shape: f32[33,32], index: 0, kind: input, shape index: {}]   ;;  %s313_s1 = inlined_call_operand.vmem [shape: f32[24,33], index: 1, kind: input, shape index: {}]   ;;  %s314_s2 = inlined_call_operand.vmem [shape: s32[2,16], index: 2, kind: input, shape index: {}]   ;;  %s315_s3 = inlined_call_operand.hbm [shape: f32[2,8], index: 3, kind: output, shape index: {}]  }
   0x1   :  { %v19_v0 = vld [vmem:[%s312_s0 + $0x20] sm:$0x1]  ;;  %v18_v1 = vld [vmem:[%s312_s0 + $0x18] sm:$0xff]  ;;  %v17_v2 = vld [vmem:[%s312_s0 + $0x10] sm:$0xff] }
   0x2   :  { %207 = vmatpush.msk.msra.mxu3 %vm34_vm0, %v19_v0  ;;  %199 = vmatpush.msk.msra.mxu0 %vm34_vm0, %v19_v0 }
   0x3   :  { %8 = vsyncpa [#allocation3], 0  ;;  %v16_v3 = vld [vmem:[%s312_s0 + $0x8] sm:$0xff]  ;;  %v15_v4 = vld [vmem:[%s312_s0] sm:$0xff]  ;;  %vm24_vm1 = vcmask 269312   ;;  %v249_v8 = vmov 18  }
   0x4   :  { %208 = vmatpush.msra.mxu3 %v18_v1  ;;  %50 = vmatpush.msra.mxu0 %v18_v1  ;;  %v21_v5 = vld [vmem:[%s313_s1 + $0x8] sm:$0xff]  ;;  %v20_v6 = vld [vmem:[%s313_s1] sm:$0xff]  ;;  %v22_v7 = vld [vmem:[%s313_s1 + $0x10] sm:$0xff]  ;;  %vm70_vm2 = vcmask 130048   ;;  %v250_v11 = vmov 2   ;;  %vm83_vm3 = vcmask 261248  }
   0x5   :  { %216 = vset.pattern.permute.xlu0 %v249_v8  ;;  %s251_s0 = smov 112   ;;  %v23_v30 = vld [vmem:[%s314_s2] sm:$0x3]  ;;  %vm99_vm5 = vcmask 123904   ;;  %s252_s2 = smov [#allocation2]   ;;  %vm181_vm10 = vcmask 58368  }
   0x6   :  { %209 = vmatpush.msra.mxu3 %v17_v2  ;;  %51 = vmatpush.msra.mxu0 %v17_v2  ;;  %vm97_vm4 = vcmp.ne.s32.totalorder %v23_v30, 0  ;;  %s188_s29 = sshll.u32 %s252_s2, 4  ;;  %s190_s5 = sshll.u32 %s315_s3, 4  ;;  %s189_s29 = int_to_ptr.vmem [resolvable:$true] %s188_s29  ;;  %s191_s5 = int_to_ptr.hbm [resolvable:$true] %s190_s5 }
   0x8   :  { %210 = vmatpush.msra.mxu3 %v16_v3  ;;  %52 = vmatpush.msra.mxu0 %v16_v3 }
   0xa   :  { %211 = vmatpush.msra.mxu3 %v15_v4  ;;  %53 = vmatpush.msra.mxu0 %v15_v4 }
   0xb   :  { %201 = vmatmul.msk.f32.vlgmr.msra.gmra.mxu3 %vm24_vm1, %v21_v5  ;;  %200 = vmatmul.msk.f32.vlgmr.msra.gmra.mxu0 %vm24_vm1, %v20_v6 }
  0x13   :  { %202 = vmatmul.msk.f32.gmra.mxu3 %vm24_vm1, %v22_v7 }
  0x88   :  { %v55_v12 = vpop.f32.mrf.mxu0 }
  0x8e   :  { %v58_v9 = vpop.f32.mrf.mxu3 }
  0x8f   :  { %203 = vmatpush.xpose.msk.msra.mxu1 %vm70_vm2, %v58_v9 }
  0x96   :  { %v61_v10 = vpop.f32.mrf.mxu3 }
  0x97   :  { %79 = vperm.xlu0 %216, %v61_v10  }
  0x9f   :  { %217 = vset.pattern.permute.xlu0 %v250_v11 }
  0xa0   :  { %66 = vperm.xlu0 %217, %v61_v10  }
  0xa8   :  { %218 = vset.pattern.permute.xlu0 %v249_v8 }
 0x109   :  { %v80_v13 = vpop.permute.xlu0 %79 }
 0x10a   :  { %v82_v14 = vmul.f32 %v80_v13, %v55_v12 }
 0x10c   :  { %v84_v15 = vsel %vm83_vm3, %v82_v14, 0.0 }
 0x10d   :  { %v85_v16 = vrot.slane %v84_v15, 4 }
 0x10f   :  { %v86_v17 = vadd.f32 %v85_v16, %v84_v15 }
 0x111   :  { %v87_v18 = vrot.slane %v86_v17, 2 }
 0x112   :  { %v67_v22 = vpop.permute.xlu0 %66 }
 0x113   :  { %v88_v19 = vadd.f32 %v87_v18, %v86_v17  ;;  %v69_v23 = vmul.f32 %v67_v22, %v55_v12 }
 0x115   :  { %v89_v20 = vrot.slane %v88_v19, 1  ;;  %v71_v24 = vsel %vm70_vm2, %v69_v23, 0.0 }
 0x116   :  { %v72_v25 = vrot.slane %v71_v24, 4 }
 0x117   :  { %v90_v21 = vadd.f32 %v89_v20, %v88_v19 }
 0x118   :  { %v73_v26 = vadd.f32 %v72_v25, %v71_v24 }
 0x119   :  { %92 = vrot.lane.b32.xlu1 %v90_v21, %s251_s0 }
 0x11a   :  { %v74_v27 = vrot.slane %v73_v26, 2 }
 0x11c   :  { %v75_v28 = vadd.f32 %v74_v27, %v73_v26 }
 0x11e   :  { %v76_v29 = vrot.slane %v75_v28, 1 }
 0x120   :  { %v77_v31 = vadd.f32 %v76_v29, %v75_v28 }
 0x18b   :  { %v93_v32 = vpop.permute.xlu1 %92 }
 0x18c   :  { %v95_v33 = vsel %vm34_vm0, %v77_v31, %v93_v32 }
 0x18d   :  { %v96_v34 = vmul.f32 0.25, %v95_v33 }
 0x18f   :  { %v98_v35 = vsel %vm97_vm4, %v96_v34, -inf }
 0x190   :  { %v100_v36 = vsel %vm99_vm5, %v98_v35, -inf }
 0x191   :  { %101 = vmax.xlane.f32.xlu1 %v100_v36 }
 0x204   :  { %v102_v37 = vpop.xlane.xlu1 %101 }
 0x205   :  { %v103_v38 = vsub.f32 %v98_v35, %v102_v37 }
 0x207   :  { %v104_v39 = vmul.f32 1.442695, %v103_v38 }
 0x209   :  { %219 = vpow2.f32 %v104_v39 }
 0x20f   :  { %v220_v40 = vpop.eup %219 }
 0x210   :  { %v106_v41 = vsel %vm99_vm5, %v220_v40, 0.0 }
 0x211   :  { %107 = vadd.xlane.f32.xlu2 %v106_v41 }
 0x229   :  { %151 = vrot.lane.b32.xlu2 %v58_v9, %s251_s0 }
 0x284   :  { %v108_v42 = vpop.xlane.xlu2 %107 }
 0x285   :  { %221 = vrcp.f32 %v108_v42  ;;  %v120_v47 = vand.u32 2147483648, %v108_v42  ;;  %v118_v49 = vand.u32 2147483647, %v108_v42  ;;  %vm114_vm7 = vweird.f32 %v108_v42 }
 0x287   :  { %v121_v51 = vor.u32 1.1754944e-38, %v120_v47  ;;  %vm119_vm9 = vcmp.eq.f32.partialorder %v118_v49, 8.507059e+37 }
 0x28b   :  { %v222_v43 = vpop.eup %221 }
 0x28c   :  { %v110_v44 = vmul.f32 %v222_v43, %v108_v42  ;;  %v152_v45 = vpop.permute.xlu2 %151  ;;  %vm115_vm6 = vweird.f32 %v222_v43 }
 0x28d   :  { %205 = vmatpush.xpose.msk.msra.mxu2 %vm70_vm2, %v152_v45  ;;  %vm116_vm8 = vmor %vm114_vm7, %vm115_vm6 }
 0x28e   :  { %v111_v46 = vsub.f32 1.0, %v110_v44 }
 0x290   :  { %v112_v48 = vmul.f32 %v222_v43, %v111_v46 }
 0x292   :  { %v113_v50 = vadd.f32 %v222_v43, %v112_v48 }
 0x294   :  { %v117_v52 = vsel %vm116_vm8, %v222_v43, %v113_v50 }
 0x295   :  { %v122_v53 = vsel %vm119_vm9, %v121_v51, %v117_v52 }
 0x296   :  { %v123_v54 = vmul.f32 %v220_v40, %v122_v53 }
 0x298   :  { %204 = vmatmul.msk.f32.vlgmr.msra.gmra.mxu1 %vm70_vm2, %v123_v54  ;;  %v150_v55 = vrot.slane %v123_v54, 1 }
 0x29a   :  { %206 = vmatmul.msk.f32.vlgmr.msra.gmra.mxu2 %vm70_vm2, %v150_v55 }
 0x315   :  { %v147_v58 = vpop.f32.mrf.mxu1 }
 0x31d   :  { %v174_v56 = vpop.f32.mrf.mxu2 }
 0x31e   :  { %v178_v57 = vrot.slane %v174_v56, 7 }
 0x320   :  { %v180_v59 = vsel %vm34_vm0, %v147_v58, %v178_v57 }
 0x321   :  { %182 = vst.msk [vmem:[#allocation2] sm:$0x3] %vm181_vm10, %v180_v59 }
 0x322   :  { %193 = dma.vmem_to_hbm [thread:$0]  %s189_s29, 32, %s191_s5, [#allocation3]  }
 0x323   :  { %247 = dma.done.wait [#allocation3], 32  }
 0x324   :  { %248 = vsyncadd [#allocation3], 4294967264 }
 0x325   :  { %198 = vsyncpa [#allocation3], 1 }

</bundles_post_ra>
